<compile_context>
chip_gen: v5e
topology: v5e:2x2
jax: 0.10.0
libtpu: 0.0.40
codegen_flags: <defaults>
</compile_context>

<pallas_src>
import functools
import math

import jax
import jax.numpy as jnp
from jax import lax
from jax.experimental import pallas as pl
from jax.experimental.pallas import tpu as pltpu


_VMEM = pl.BlockSpec(memory_space=pltpu.MemorySpace.VMEM)


# ---------------------------------------------------------------------------
# One-time, parameter-only precompute (hoisted out of the per-step kernels).
# ---------------------------------------------------------------------------
def precompute_const_params(K1, K2, K1_mask):
    """Time-invariant folds of the const-K parameters.

    AT[c,j,i] = A[c,i,j] = K1[c,i,j]^2 * mask[i,j]   (transposed inbound flux)
    D[c,j]    = K2[c,j] - sum_i A[c,j,i]             (self term - outbound flux)
    """
    A = jnp.square(K1) * K1_mask[None, :, :]
    D = K2 - jnp.sum(A, axis=2)
    AT = jnp.swapaxes(A, 1, 2)
    return AT.astype(jnp.float32), D.astype(jnp.float32)


def precompute_step_matrix(AT, D, dt):
    """Explicit-Euler step matrix, transposed layout.

    y_{t+1}[c,j] = sum_i MT[c,j,i] * y_t[c,i]
    MT[c,j,i]    = dt*A[c,i,j] + delta_ij * (1 + dt*D[c,j])
    """
    _, P, _ = AT.shape
    eye = jnp.eye(P, dtype=jnp.float32)
    MT = dt * AT + eye[None, :, :] * (1.0 + dt * D)[:, :, None]
    return MT.astype(jnp.float32)


# ---------------------------------------------------------------------------
# Kernel 1: single RHS evaluation (exact parity with ODEBlock._const_forward).
# Kept for module-forward parity only; for a one-off eval embedded in a larger
# JAX program the plain einsum fuses better than a custom call.
# ---------------------------------------------------------------------------
def ode_rhs_kernel(y_ref, at_ref, d_ref, out_ref):
    y = y_ref[...]            # (C, P)   P in lanes
    AT = at_ref[...]          # (C, P, P) AT[c,j,i]
    D = d_ref[...]            # (C, P)
    # z_in[c,j] = sum_i y[c,i] * A[c,i,j]; y broadcast over sublanes (stride-0),
    # reduce over lanes (intra-vreg). Deliberately not a jnp.dot (P=11 would
    # waste the MXU).
    z_in = jnp.sum(y[:, None, :] * AT, axis=2)
    out_ref[...] = z_in + y * D


def ode_block_const_forward(t, y, AT, D):
    """Single dy/dt evaluation, matching the PyTorch module's forward(t, y)."""
    del t  # unused by the const forward (matches PyTorch)
    C, P = y.shape
    flops = 2 * C * P * P + 2 * C * P
    bytes_accessed = 4 * (C * P * P + 3 * C * P)
    return pl.pallas_call(
        ode_rhs_kernel,
        out_shape=jax.ShapeDtypeStruct((C, P), jnp.float32),
        in_specs=[_VMEM, _VMEM, _VMEM],
        out_specs=_VMEM,
        cost_estimate=pl.CostEstimate(
            flops=flops, transcendentals=0, bytes_accessed=bytes_accessed),
    )(y, AT, D)


# ---------------------------------------------------------------------------
# Kernel 2: fused explicit-Euler integrator — the whole time loop in ONE call.
# State y lives in vregs as the fori_loop carry; MT is VMEM-resident for the
# entire loop; trip count is static and the loop is unrolled.
# ---------------------------------------------------------------------------
def euler_fused_kernel(y0_ref, mt_ref, yT_ref, *, num_steps, unroll):
    MT = mt_ref[...]          # (C, P, P)  resident for the whole loop

    def step(_, y):
        # y_{t+1}[c,j] = sum_i MT[c,j,i] * y_t[c,i]
        return jnp.sum(y[:, None, :] * MT, axis=2)

    yT_ref[...] = lax.fori_loop(0, num_steps, step, y0_ref[...], unroll=unroll)


def ode_integrate_euler(y0, MT, num_steps, *, unroll=8):
    """Integrate dy/dt = f_const(y) with explicit Euler, fully fused on-chip."""
    C, P = y0.shape
    num_steps = int(num_steps)
    unroll = max(1, min(int(unroll), max(num_steps, 1)))
    kernel = functools.partial(
        euler_fused_kernel, num_steps=num_steps, unroll=unroll)
    flops = num_steps * 2 * C * P * P
    bytes_accessed = 4 * (C * P * P + 2 * C * P)
    return pl.pallas_call(
        kernel,
        out_shape=jax.ShapeDtypeStruct((C, P), jnp.float32),
        in_specs=[_VMEM, _VMEM],
        out_specs=_VMEM,
        cost_estimate=pl.CostEstimate(
            flops=flops, transcendentals=0, bytes_accessed=bytes_accessed),
    )(y0, MT)


# ---------------------------------------------------------------------------
# Long-integration fast path (pure JAX): the const-K RHS is linear and
# time-invariant, so y_T = MT^n @ y_0.  Repeated squaring turns the O(n) serial
# chain into O(log n) tiny batched matmuls.  Note: FP reassociation drifts at
# the ~ulp level from step-by-step Euler.
# ---------------------------------------------------------------------------
def ode_integrate_matpow(y0, MT, num_steps):
    P = MT.shape[-1]

    def bmm(X, Y):
        return jnp.einsum('cjk,cki->cji', X, Y)

    result = jnp.broadcast_to(jnp.eye(P, dtype=MT.dtype), MT.shape)
    base = MT
    n = int(num_steps)
    while n > 0:
        if n & 1:
            result = bmm(result, base)
        base = bmm(base, base)
        n >>= 1
    return jnp.einsum('cji,ci->cj', result, y0)


# ---------------------------------------------------------------------------
# Deterministic parameter init mimicking the module's linear_init:
# kaiming_uniform(a=sqrt(5)) on (out,in) weight => U(-1/sqrt(in), 1/sqrt(in)),
# transposed, stacked over clones, divided by 2.
# ---------------------------------------------------------------------------
def init_params(key, num_clones, num_pops):
    k1_key, k2_key, mask_key = jax.random.split(key, 3)

    bound = 1.0 / math.sqrt(num_pops)
    K1 = jax.random.uniform(
        k1_key, (num_clones, num_pops, num_pops),
        minval=-bound, maxval=bound, dtype=jnp.float32) / 2.0

    # torch stores K2 as (C, P, 1); we keep the squeezed (C, P) form.
    K2 = jax.random.uniform(
        k2_key, (num_clones, num_pops),
        minval=-bound, maxval=bound, dtype=jnp.float32) / 2.0

    # PAGA-style constraint matrix L: 0/1 mask with zero diagonal.
    bern = jax.random.bernoulli(mask_key, p=0.5, shape=(num_pops, num_pops))
    K1_mask = bern.astype(jnp.float32) * (1.0 - jnp.eye(num_pops, dtype=jnp.float32))

    return K1, K2, K1_mask


# ---------------------------------------------------------------------------
# Pure-JAX references for validation.
# ---------------------------------------------------------------------------
def reference_const_forward(y, K1, K2, K1_mask):
    A = jnp.square(K1) * K1_mask[None, :, :]
    z = jnp.einsum('ci,cij->cj', y, A)
    z = z + y * K2
    z = z - y * jnp.sum(A, axis=2)
    return z


def reference_euler(y0, K1, K2, K1_mask, dt, num_steps):
    def body(_, y):
        return y + dt * reference_const_forward(y, K1, K2, K1_mask)
    return lax.fori_loop(0, num_steps, body, y0)


if __name__ == "__main__":
    num_clones, num_pops = 7, 11   # module defaults

    key = jax.random.PRNGKey(0)
    pkey, ykey = jax.random.split(key)
    K1, K2, K1_mask = init_params(pkey, num_clones, num_pops)

    # y: cell-population abundances per clone, (C, P)
    y = jax.random.uniform(ykey, (num_clones, num_pops), dtype=jnp.float32)
    t = jnp.float32(0.0)   # unused by the const forward, kept for API parity

    # one-time hoist of parameter-only math
    AT, D = precompute_const_params(K1, K2, K1_mask)

    # --- single RHS evaluation (module forward parity) ---
    out = jax.block_until_ready(ode_block_const_forward(t, y, AT, D))
    ref = reference_const_forward(y, K1, K2, K1_mask)
    assert out.shape == (num_clones, num_pops)
    assert jnp.allclose(out, ref, atol=1e-5, rtol=1e-5)

    # --- fused integration loop: all solver steps in one pallas_call ---
    dt, num_steps = 0.01, 64
    MT = precompute_step_matrix(AT, D, dt)
    yT = jax.block_until_ready(ode_integrate_euler(y, MT, num_steps, unroll=8))
    refT = reference_euler(y, K1, K2, K1_mask, dt, num_steps)
    assert yT.shape == (num_clones, num_pops)
    assert jnp.allclose(yT, refT, atol=1e-4, rtol=1e-4)

    # --- matrix-power fast path (pure JAX, O(log n)); reassociation drift ---
    yT_pow = jax.block_until_ready(ode_integrate_matpow(y, MT, num_steps))
    assert jnp.allclose(yT_pow, refT, atol=1e-3, rtol=1e-3)

    # TODO(synk): K_type='dynamic' branch (LayerNorm + per-clone MLP encode/
    # decode of K1/K2) is not implemented; the module's default 'const' path
    # is covered.
    print("KERNEL_OK")
</pallas_src>

<mosaic_0001>
module attributes {stable_mosaic.version = 11 : i64} {
  func.func @ode_rhs_kernel(%arg0: memref<7x11xf32, #tpu.memory_space<vmem>>, %arg1: memref<7x11x11xf32, #tpu.memory_space<vmem>>, %arg2: memref<7x11xf32, #tpu.memory_space<vmem>>, %arg3: memref<7x11xf32, #tpu.memory_space<vmem>>) attributes {dimension_semantics = [], scalar_prefetch = 0 : i64, scratch_operands = 0 : i64, tpu.core_type = #tpu.core_type<tc>} {
    %c0 = arith.constant 0 : index
    %c0_0 = arith.constant 0 : index
    %0 = vector.load %arg0[%c0, %c0_0] : memref<7x11xf32, #tpu.memory_space<vmem>>, vector<7x11xf32>
    %c0_1 = arith.constant 0 : index
    %c0_2 = arith.constant 0 : index
    %c0_3 = arith.constant 0 : index
    %1 = vector.load %arg1[%c0_1, %c0_2, %c0_3] : memref<7x11x11xf32, #tpu.memory_space<vmem>>, vector<7x11x11xf32>
    %c0_4 = arith.constant 0 : index
    %c0_5 = arith.constant 0 : index
    %2 = vector.load %arg2[%c0_4, %c0_5] : memref<7x11xf32, #tpu.memory_space<vmem>>, vector<7x11xf32>
    %3 = vector.shape_cast %0 : vector<7x11xf32> to vector<7x1x11xf32>
    %4 = vector.broadcast %3 : vector<7x1x11xf32> to vector<7x11x11xf32>
    %5 = arith.mulf %4, %1 : vector<7x11x11xf32>
    %cst = arith.constant dense<0.000000e+00> : vector<7x11xf32>
    %6 = vector.multi_reduction <add>, %5, %cst [2] : vector<7x11x11xf32> to vector<7x11xf32>
    %7 = arith.mulf %0, %2 : vector<7x11xf32>
    %8 = arith.addf %6, %7 : vector<7x11xf32>
    %c0_6 = arith.constant 0 : index
    %c0_7 = arith.constant 0 : index
    %9 = vector.load %arg3[%c0_6, %c0_7] : memref<7x11xf32, #tpu.memory_space<vmem>>, vector<7x11xf32>
    tpu.vector_store %arg3[%c0_6, %c0_7], %8 {strides = array<i32>} : memref<7x11xf32, #tpu.memory_space<vmem>>, vector<7x11xf32>,
    return
  }
}

</mosaic_0001>

<bundles_post_ra>
// kernel: tpu_custom_call.1
= control target key start
LH: loop header
LB: loop body
LE: loop exit
PB: predicated region body
PF: predicated region fallthrough
CT: control target
= control target key end

     0   :  { %vm66_vm0 = vcmask 89088   ;;  %s497_s0 = inlined_call_operand.vmem [shape: f32[7,11], index: 0, kind: input, shape index: {}]   ;;  %s498_s1 = inlined_call_operand.vmem [shape: f32[7,11,11], index: 1, kind: input, shape index: {}]   ;;  %s499_s2 = inlined_call_operand.vmem [shape: f32[7,11], index: 2, kind: input, shape index: {}]   ;;  %s500_s3 = inlined_call_operand.hbm [shape: f32[7,11], index: 3, kind: output, shape index: {}]  }
   0x1   :  { %v408_v0 = vld [vmem:[%s497_s0] sm:$0x7f]  ;;  %v18_v6 = vld [vmem:[%s498_s1 + $0x10] sm:$0xff]  ;;  %v17_v10 = vld [vmem:[%s498_s1 + $0x8] sm:$0x7] }
   0x2   :  { %v16_v1 = vld [vmem:[%s498_s1] sm:$0xff]  ;;  %v38_v2 = vperm.slane %v408_v0, 0  ;;  %v33_v3 = vrot.slane %v408_v0, 2  ;;  %v32_v4 = vrot.slane %v408_v0, 1  ;;  %v21_v14 = vld [vmem:[%s498_s1 + $0x28] sm:$0x7] }
   0x3   :  { %v20_v5 = vld [vmem:[%s498_s1 + $0x20] sm:$0xff]  ;;  %v19_v15 = vld [vmem:[%s498_s1 + $0x18] sm:$0x7] }
   0x4   :  { %v52_v7 = vmul.f32 %v38_v2, %v16_v1  ;;  %v40_v8 = vperm.slane %v33_v3, 0  ;;  %v39_v9 = vperm.slane %v32_v4, 0 }
   0x6   :  { %v67_v11 = vsel %vm66_vm0, %v52_v7, 0.0  ;;  %v56_v12 = vmul.f32 %v40_v8, %v20_v5  ;;  %v54_v13 = vmul.f32 %v39_v9, %v18_v6 }
   0x7   :  { %68 = vadd.xlane.f32.xlu0 %v67_v11 }
   0x8   :  { %8 = vsyncpa [#allocation3], 0  ;;  %v80_v16 = vsel %vm66_vm0, %v56_v12, 0.0  ;;  %v74_v17 = vsel %vm66_vm0, %v54_v13, 0.0  ;;  %v53_v18 = vmul.f32 %v38_v2, %v17_v10  ;;  %v34_v19 = vrot.slane %v408_v0, 3  ;;  %v22_v26 = vld [vmem:[%s498_s1 + $0x30] sm:$0xff] }
   0x9   :  { %81 = vadd.xlane.f32.xlu2 %v80_v16  ;;  %75 = vadd.xlane.f32.xlu1 %v74_v17  ;;  %vm70_vm1 = vcmask 83968   ;;  %v57_v20 = vmul.f32 %v40_v8, %v21_v14  ;;  %v55_v21 = vmul.f32 %v39_v9, %v19_v15  ;;  %v35_v22 = vrot.slane %v408_v0, 4  ;;  %v24_v31 = vld [vmem:[%s498_s1 + $0x40] sm:$0xff]  ;;  %v23_v32 = vld [vmem:[%s498_s1 + $0x38] sm:$0x7]  ;;  %v26_v43 = vld [vmem:[%s498_s1 + $0x50] sm:$0xff] }
   0xa   :  { %v113_v23 = vlaneseq  ;;  %v71_v24 = vsel %vm70_vm1, %v53_v18, 0.0  ;;  %v41_v25 = vperm.slane %v34_v19, 0  ;;  %v36_v36 = vrot.slane %v408_v0, 5  ;;  %v25_v38 = vld [vmem:[%s498_s1 + $0x48] sm:$0x7]  ;;  %v28_v50 = vld [vmem:[%s498_s1 + $0x60] sm:$0xff] }
   0xb   :  { %v83_v28 = vsel %vm70_vm1, %v57_v20, 0.0  ;;  %v77_v29 = vsel %vm70_vm1, %v55_v21, 0.0  ;;  %v42_v30 = vperm.slane %v35_v22, 0  ;;  %v27_v42 = vld [vmem:[%s498_s1 + $0x58] sm:$0x7]  ;;  %v37_v45 = vrot.slane %v408_v0, 6 }
   0xc   :  { %v441_v27 = vshrl.u32 %v113_v23, 7  ;;  %v58_v33 = vmul.f32 %v41_v25, %v22_v26  ;;  %v59_v35 = vmul.f32 %v41_v25, %v23_v32  ;;  %v43_v41 = vperm.slane %v36_v36, 0  ;;  %v29_v53 = vld [vmem:[%s498_s1 + $0x68] sm:$0x7]  ;;  %v30_v58 = vld [vmem:[%s499_s2] sm:$0x7f] }
   0xd   :  { %v60_v34 = vmul.f32 %v42_v30, %v24_v31  ;;  %v61_v44 = vmul.f32 %v42_v30, %v25_v38  ;;  %v44_v49 = vperm.slane %v37_v45, 0  ;;  %v110_v59 = vmul.f32 %v30_v58, %v408_v0  ;;  %s384_s1 = smov [#allocation2]   ;;  %s334_s18 = sshll.u32 %s500_s3, 4  ;;  %s335_s18 = int_to_ptr.hbm [resolvable:$true] %s334_s18 }
   0xe   :  { %345 = vset.pattern.permute.xlu2 %v441_v27  ;;  %350 = vset.pattern.permute.xlu0 %v441_v27  ;;  %v86_v37 = vsel %vm66_vm0, %v58_v33, 0.0  ;;  %v89_v40 = vsel %vm70_vm1, %v59_v35, 0.0  ;;  %v63_v46 = vmul.f32 %v43_v41, %v27_v42  ;;  %v62_v47 = vmul.f32 %v43_v41, %v26_v43  ;;  %s332_s2 = sshll.u32 %s384_s1, 4  ;;  %s333_s2 = int_to_ptr.vmem [resolvable:$true] %s332_s2 }
   0xf   :  { %72 = vadd.xlane.f32.xlu0 %v71_v24  ;;  %346 = vset.pattern.permute.xlu1 %v441_v27  ;;  %v92_v39 = vsel %vm66_vm0, %v60_v34, 0.0  ;;  %v95_v48 = vsel %vm70_vm1, %v61_v44, 0.0  ;;  %v64_v54 = vmul.f32 %v44_v49, %v28_v50  ;;  %v65_v55 = vmul.f32 %v44_v49, %v29_v53 }
  0x10   :  { %v101_v51 = vsel %vm70_vm1, %v63_v46, 0.0  ;;  %v98_v52 = vsel %vm66_vm0, %v62_v47, 0.0  ;;  %v112_v60 = vperm.slane %v110_v59, 0  ;;  %v164_v61 = vperm.slane %v110_v59, 4 }
  0x11   :  { %84 = vadd.xlane.f32.xlu2 %v83_v28  ;;  %78 = vadd.xlane.f32.xlu1 %v77_v29  ;;  %v104_v56 = vsel %vm66_vm0, %v64_v54, 0.0  ;;  %v107_v57 = vsel %vm70_vm1, %v65_v55, 0.0  ;;  %v121_v62 = vadd.s32 8, %v441_v27  ;;  %v125_v63 = vperm.slane %v110_v59, 1 }
  0x12   :  { %v138_v1 = vperm.slane %v110_v59, 2  ;;  %v190_v2 = vperm.slane %v110_v59, 6  ;;  %v151_v0 = vperm.slane %v110_v59, 3  ;;  %v177_v3 = vperm.slane %v110_v59, 5 }
  0x13   :  { %v383_v5 = vmov 0   ;;  %v288_v55 = vand.u32 127, %v113_v23  ;;  %vm292_vm2 = vcmask 130112   ;;  %vm312_vm3 = vcmask 1041409  }
  0x14   :  { %vm314_vm4 = vcmask 1042434   ;;  %vm316_vm5 = vcmask 1043459   ;;  %vm318_vm6 = vcmask 1044484   ;;  %vm320_vm7 = vcmask 1045509  }
  0x15   :  { %v290_v58 = vadd.s32 4294967288, %v288_v55  ;;  %vm322_vm8 = vcmask 1046534   ;;  %vm325_vm9 = vcmask 88064  }
  0x17   :  { %87 = vadd.xlane.f32.xlu0 %v86_v37 }
  0x19   :  { %93 = vadd.xlane.f32.xlu2 %v92_v39  ;;  %90 = vadd.xlane.f32.xlu1 %v89_v40 }
  0x1f   :  { %96 = vadd.xlane.f32.xlu0 %v95_v48 }
  0x21   :  { %102 = vadd.xlane.f32.xlu2 %v101_v51  ;;  %99 = vadd.xlane.f32.xlu1 %v98_v52 }
  0x27   :  { %105 = vadd.xlane.f32.xlu0 %v104_v56 }
  0x29   :  { %108 = vadd.xlane.f32.xlu1 %v107_v57 }
  0x39   :  { %117 = vperm.xlu2 %345, %v112_v60  }
  0x3b   :  { %169 = vperm.xlu0 %350, %v164_v61  }
  0x41   :  { %347 = vset.pattern.permute.xlu2 %v121_v62 }
  0x42   :  { %130 = vperm.xlu1 %346, %v125_v63  }
  0x43   :  { %351 = vset.pattern.permute.xlu0 %v121_v62 }
  0x49   :  { %136 = vperm.xlu2 %347, %v125_v63  }
  0x4a   :  { %349 = vset.pattern.permute.xlu1 %v121_v62 }
  0x4b   :  { %123 = vperm.xlu0 %351, %v112_v60  }
  0x51   :  { %348 = vset.pattern.permute.xlu2 %v441_v27 }
  0x52   :  { %149 = vperm.xlu1 %349, %v138_v1  }
  0x53   :  { %201 = vperm.xlu0 %351, %v190_v2  }
  0x59   :  { %143 = vperm.xlu2 %348, %v138_v1  }
  0x5a   :  { %162 = vperm.xlu1 %349, %v151_v0  }
  0x5b   :  { %355 = vset.pattern.permute.xlu0 %v383_v5 }
  0x61   :  { %156 = vperm.xlu2 %348, %v151_v0  }
  0x62   :  { %353 = vset.pattern.permute.xlu1 %v441_v27 }
  0x69   :  { %352 = vset.pattern.permute.xlu2 %v121_v62 }
  0x6a   :  { %182 = vperm.xlu1 %353, %v177_v3  }
  0x71   :  { %175 = vperm.xlu2 %352, %v164_v61  }
  0x72   :  { %195 = vperm.xlu1 %353, %v190_v2  }
  0x79   :  { %188 = vperm.xlu2 %352, %v177_v3  }
  0x7a   :  { %356 = vset.pattern.permute.xlu1 %v383_v5  ;;  %v69_v10 = vpop.xlane.xlu0 %68 }
  0x7c   :  { %v82_v4 = vpop.xlane.xlu2 %81  ;;  %v76_v6 = vpop.xlane.xlu1 %75 }
  0x81   :  { %354 = vset.pattern.permute.xlu2 %v383_v5 }
  0x82   :  { %v73_v13 = vpop.xlane.xlu0 %72 }
  0x84   :  { %v85_v7 = vpop.xlane.xlu2 %84  ;;  %v79_v9 = vpop.xlane.xlu1 %78 }
  0x8a   :  { %v88_v17 = vpop.xlane.xlu0 %87 }
  0x8c   :  { %v94_v8 = vpop.xlane.xlu2 %93  ;;  %v91_v12 = vpop.xlane.xlu1 %90 }
  0x92   :  { %v97_v20 = vpop.xlane.xlu0 %96 }
  0x94   :  { %v103_v11 = vpop.xlane.xlu2 %102  ;;  %v100_v16 = vpop.xlane.xlu1 %99 }
  0x9a   :  { %v106_v26 = vpop.xlane.xlu0 %105 }
  0x9c   :  { %v118_v14 = vpop.permute.xlu2 %117  ;;  %v109_v19 = vpop.xlane.xlu1 %108 }
  0x9d   :  { %v217_v15 = vadd.f32 %v118_v14, %v69_v10 }
  0x9f   :  { %246 = vperm.xlu2 %354, %v217_v15  }
  0xa4   :  { %v137_v18 = vpop.permute.xlu2 %136 }
  0xa5   :  { %v220_v36 = vadd.f32 %v137_v18, %v79_v9 }
  0xad   :  { %v170_v29 = vpop.permute.xlu0 %169 }
  0xae   :  { %v225_v30 = vadd.f32 %v170_v29, %v94_v8 }
  0xb3   :  { %v144_v21 = vpop.permute.xlu2 %143 }
  0xb4   :  { %v221_v22 = vadd.f32 %v144_v21, %v82_v4  ;;  %v131_v24 = vpop.permute.xlu1 %130 }
  0xb5   :  { %v219_v25 = vadd.f32 %v131_v24, %v76_v6 }
  0xb6   :  { %258 = vperm.xlu0 %355, %v221_v22  }
  0xb7   :  { %252 = vperm.xlu2 %354, %v219_v25  }
  0xbb   :  { %v157_v27 = vpop.permute.xlu2 %156 }
  0xbc   :  { %v223_v28 = vadd.f32 %v157_v27, %v88_v17 }
  0xbd   :  { %v124_v31 = vpop.permute.xlu0 %123 }
  0xbe   :  { %264 = vperm.xlu1 %356, %v223_v28   ;;  %v218_v34 = vadd.f32 %v124_v31, %v73_v13 }
  0xc4   :  { %v150_v32 = vpop.permute.xlu1 %149 }
  0xc5   :  { %v222_v43 = vadd.f32 %v150_v32, %v85_v7  ;;  %v202_v46 = vpop.permute.xlu0 %201 }
  0xc6   :  { %270 = vperm.xlu1 %356, %v225_v30   ;;  %v230_v47 = vadd.f32 %v202_v46, %v109_v19 }
  0xcb   :  { %v176_v33 = vpop.permute.xlu2 %175 }
  0xcc   :  { %v226_v35 = vadd.f32 %v176_v33, %v97_v20  ;;  %v163_v37 = vpop.permute.xlu1 %162 }
  0xcd   :  { %v224_v45 = vadd.f32 %v163_v37, %v91_v12 }
  0xce   :  { %273 = vperm.xlu0 %355, %v226_v35   ;;  %249 = vperm.xlu1 %356, %v218_v34  }
  0xd3   :  { %v189_v38 = vpop.permute.xlu2 %188 }
  0xd4   :  { %v228_v39 = vadd.f32 %v189_v38, %v103_v11 }
  0xd6   :  { %255 = vperm.xlu1 %356, %v220_v36  }
  0xdc   :  { %v183_v40 = vpop.permute.xlu1 %182 }
  0xdd   :  { %v227_v41 = vadd.f32 %v183_v40, %v100_v16 }
  0xde   :  { %279 = vperm.xlu1 %356, %v228_v39  }
  0xdf   :  { %276 = vperm.xlu2 %354, %v227_v41  }
  0xe4   :  { %v196_v42 = vpop.permute.xlu1 %195 }
  0xe5   :  { %v229_v44 = vadd.f32 %v196_v42, %v106_v26 }
  0xe7   :  { %261 = vperm.xlu2 %354, %v222_v43   ;;  %282 = vperm.xlu0 %355, %v229_v44  }
  0xef   :  { %267 = vperm.xlu2 %354, %v224_v45  }
  0xf7   :  { %285 = vperm.xlu2 %354, %v230_v47  }
  0xf9   :  { %v247_v48 = vpop.permute.xlu2 %246 }
  0xfa   :  { %v289_v63 = vperm.slane %v247_v48, %v288_v55 }
 0x111   :  { %v253_v50 = vpop.permute.xlu2 %252 }
 0x112   :  { %v294_v60 = vperm.slane %v253_v50, %v288_v55 }
 0x128   :  { %v259_v57 = vpop.permute.xlu0 %258 }
 0x129   :  { %v297_v5 = vperm.slane %v259_v57, %v288_v55 }
 0x130   :  { %v265_v49 = vpop.permute.xlu1 %264 }
 0x131   :  { %v300_v7 = vperm.slane %v265_v49, %v288_v55 }
 0x138   :  { %v271_v51 = vpop.permute.xlu1 %270 }
 0x139   :  { %v277_v52 = vpop.permute.xlu2 %276  ;;  %v303_v15 = vperm.slane %v271_v51, %v288_v55 }
 0x13a   :  { %v306_v13 = vperm.slane %v277_v52, %v288_v55 }
 0x140   :  { %v250_v53 = vpop.permute.xlu1 %249  ;;  %v274_v0 = vpop.permute.xlu0 %273 }
 0x141   :  { %v262_v54 = vpop.permute.xlu2 %261  ;;  %v291_v61 = vperm.slane %v250_v53, %v290_v58  ;;  %v304_v12 = vperm.slane %v274_v0, %v290_v58 }
 0x142   :  { %v298_v2 = vperm.slane %v262_v54, %v290_v58 }
 0x143   :  { %v293_v3 = vsel %vm292_vm2, %v291_v61, %v289_v63  ;;  %v305_v19 = vsel %vm292_vm2, %v304_v12, %v303_v15 }
 0x144   :  { %v299_v8 = vsel %vm292_vm2, %v298_v2, %v297_v5 }
 0x148   :  { %v256_v56 = vpop.permute.xlu1 %255 }
 0x149   :  { %v295_v59 = vperm.slane %v256_v56, %v290_v58  ;;  %v268_v62 = vpop.permute.xlu2 %267 }
 0x14a   :  { %v301_v4 = vperm.slane %v268_v62, %v290_v58 }
 0x14b   :  { %v296_v1 = vsel %vm292_vm2, %v295_v59, %v294_v60 }
 0x14c   :  { %v313_v6 = vsel %vm312_vm3, %v296_v1, %v293_v3  ;;  %v302_v9 = vsel %vm292_vm2, %v301_v4, %v300_v7 }
 0x14d   :  { %v315_v10 = vsel %vm314_vm4, %v299_v8, %v313_v6 }
 0x14e   :  { %v317_v16 = vsel %vm316_vm5, %v302_v9, %v315_v10 }
 0x14f   :  { %v319_v22 = vsel %vm318_vm6, %v305_v19, %v317_v16 }
 0x150   :  { %v280_v23 = vpop.permute.xlu1 %279 }
 0x151   :  { %v307_v11 = vperm.slane %v280_v23, %v290_v58  ;;  %v286_v14 = vpop.permute.xlu2 %285 }
 0x152   :  { %v310_v20 = vperm.slane %v286_v14, %v290_v58 }
 0x153   :  { %v308_v17 = vsel %vm292_vm2, %v307_v11, %v306_v13 }
 0x154   :  { %v321_v25 = vsel %vm320_vm7, %v308_v17, %v319_v22 }
 0x159   :  { %v283_v18 = vpop.permute.xlu0 %282 }
 0x15a   :  { %v309_v21 = vperm.slane %v283_v18, %v288_v55 }
 0x15c   :  { %v311_v24 = vsel %vm292_vm2, %v310_v20, %v309_v21 }
 0x15d   :  { %v323_v26 = vsel %vm322_vm8, %v311_v24, %v321_v25 }
 0x15e   :  { %326 = vst.msk [vmem:[#allocation2] sm:$0x7f] %vm325_vm9, %v323_v26 }
 0x15f   :  { %337 = dma.vmem_to_hbm [thread:$0]  %s333_s2, 128, %s335_s18, [#allocation3]  }
 0x160   :  { %381 = dma.done.wait [#allocation3], 128  }
 0x161   :  { %382 = vsyncadd [#allocation3], 4294967168 }
 0x162   :  { %342 = vsyncpa [#allocation3], 1 }

</bundles_post_ra>
